<compile_context>
chip_gen: v7x
topology: tpu7x:2x2x1
jax: 0.10.0
libtpu: 0.0.40
codegen_flags: <defaults>
</compile_context>

<pallas_src>
import jax
import jax.numpy as jnp
import numpy as np
from jax import lax
from jax.experimental import pallas as pl
from jax.experimental.pallas import tpu as pltpu

_LANES = 128


def _lrn_kernel(x_ref, o_ref, psq_ref):
    # x_ref / o_ref: (C, TILE_S, 128) f32 slabs for one batch element / spatial tile.
    # psq_ref:       (C + 4, TILE_S, 128) VMEM scratch: squares with a 2-channel zero
    #                halo on each side, written in place (no concatenate temp).
    x = x_ref[...]
    C = x.shape[0]
    sq = x * x

    zhalo = jnp.zeros((2,) + x.shape[1:], x.dtype)
    psq_ref[pl.ds(0, 2)] = zhalo                 # halos re-zeroed every step: cheap,
    psq_ref[pl.ds(C + 2, 2)] = zhalo             # and safe under megacore sharding
    psq_ref[pl.ds(2, C)] = sq

    # Clipped 5-wide window sum over channels: 4 full-tile VPU adds of leading-axis
    # slices of the halo'd scratch (center term reused from the live `sq` vregs).
    sumsq = (psq_ref[pl.ds(0, C)] + psq_ref[pl.ds(1, C)] + sq
             + psq_ref[pl.ds(3, C)] + psq_ref[pl.ds(4, C)])

    base = 2.0 + 0.0001 * sumsq                  # k = 2.0, alpha = 1e-4 (no /n, per module)
    inv = lax.rsqrt(base)                        # base**-0.5 on the EUP
    o_ref[...] = x * (inv * jnp.sqrt(inv))       # x * base**-0.75, no pow / no divide


def lrn(x):
    """x: (N, C, H, W) float32 -> (N, C, H, W) float32 (matches the PyTorch LRN module)."""
    N, C, H, W = x.shape
    HW = H * W

    # Only pad the flattened spatial axis when it is not lane-aligned; the reshapes are
    # free, so the common aligned case is exactly one HBM read + one HBM write.
    needs_pad = (HW % _LANES) != 0
    HW_pad = ((HW + _LANES - 1) // _LANES) * _LANES
    xf = x.reshape(N, C, HW)
    if needs_pad:
        xf = jnp.pad(xf, ((0, 0), (0, 0), (0, HW_pad - HW)))
    S = HW_pad // _LANES
    x4 = xf.reshape(N, C, S, _LANES)

    # Per-generation VMEM budget: v7x has 64 MiB/TC, v5e/v6e have 128 MiB.
    try:
        vmem_cap = int(pltpu.get_tpu_info().vmem_capacity_bytes)
    except Exception:
        vmem_cap = 64 * 1024 * 1024
    vmem_limit = min(vmem_cap // 2, 64 * 1024 * 1024)

    # Largest spatial tile so that 2x(in) + 2x(out) double buffers + (C+4)-row scratch
    # + temps (~6 input-sized blocks) stay under the limit.
    bytes_per_row = C * _LANES * 4                              # one f32 row, all channels
    tile_s = max(8, ((vmem_limit // 8) // bytes_per_row) // 8 * 8)
    if tile_s >= S:
        tile_s = S                                              # single spatial block (== full dim)
    # TODO(synk): for very large C (where even an 8-row block overflows the budget) add
    # channel tiling with a +-2 channel halo; until then grow the limit to fit.
    block_bytes = C * tile_s * _LANES * 4
    scratch_bytes = (C + 4) * tile_s * _LANES * 4
    vmem_limit = min(max(vmem_limit, 4 * block_bytes + scratch_bytes + (2 << 20)),
                     vmem_cap)

    grid = (N, pl.cdiv(S, tile_s))
    out = pl.pallas_call(
        _lrn_kernel,
        out_shape=jax.ShapeDtypeStruct((N, C, S, _LANES), x.dtype),
        grid_spec=pltpu.PrefetchScalarGridSpec(
            num_scalar_prefetch=0,
            grid=grid,
            in_specs=[pl.BlockSpec((None, C, tile_s, _LANES),
                                   lambda n, s: (n, 0, s, 0))],
            out_specs=pl.BlockSpec((None, C, tile_s, _LANES),
                                   lambda n, s: (n, 0, s, 0)),
            scratch_shapes=[pltpu.VMEM((C + 4, tile_s, _LANES), x.dtype)]),
        compiler_params=pltpu.CompilerParams(
            dimension_semantics=("parallel", "parallel"),
            vmem_limit_bytes=int(vmem_limit)),
    )(x4)

    out = out.reshape(N, C, HW_pad)
    if needs_pad:
        # TODO(synk): if the consumer can accept the lane-padded (N, C, HW_pad) layout,
        # keep it and skip this extra HBM pass.
        out = out[:, :, :HW]
    return out.reshape(N, C, H, W)


def lrn_ref(x):
    """Pure-JAX reference with identical semantics to the PyTorch module."""
    sq = x ** 2
    C = x.shape[1]
    p = jnp.pad(sq, ((0, 0), (2, 2), (0, 0), (0, 0)))
    sumsq = sum(p[:, k:k + C] for k in range(5))
    return x / (2.0 + 0.0001 * sumsq) ** 0.75


if __name__ == "__main__":
    key = jax.random.PRNGKey(0)
    x = jax.random.normal(key, (2, 4, 16, 16), dtype=jnp.float32)

    y = lrn(x)
    jax.block_until_ready(y)

    y_ref = lrn_ref(x)
    assert np.allclose(np.asarray(y), np.asarray(y_ref), rtol=1e-5, atol=1e-5), (
        "Pallas LRN mismatch vs reference"
    )
    print("KERNEL_OK")
</pallas_src>

<mosaic_0001>
module attributes {stable_mosaic.version = 11 : i64} {
  func.func @_lrn_kernel(%arg0: i32, %arg1: i32, %arg2: memref<1x4x2x128xf32, #tpu.memory_space<vmem>>, %arg3: memref<1x4x2x128xf32, #tpu.memory_space<vmem>>, %arg4: memref<8x2x128xf32, #tpu.memory_space<vmem>>) attributes {dimension_semantics = [#tpu.dimension_semantics<parallel>, #tpu.dimension_semantics<parallel>], iteration_bounds = array<i64: 2, 1>, scalar_prefetch = 0 : i64, scratch_operands = 1 : i64, tpu.core_type = #tpu.core_type<tc>, window_params = [{transform_indices = @transform_0, window_bounds = array<i64: 1, 4, 2, 128>}, {transform_indices = @transform_1, window_bounds = array<i64: 1, 4, 2, 128>}]} {
    %c0 = arith.constant 0 : index
    %c0_0 = arith.constant 0 : index
    %c0_1 = arith.constant 0 : index
    %c0_2 = arith.constant 0 : index
    %0 = vector.load %arg2[%c0, %c0_0, %c0_1, %c0_2] : memref<1x4x2x128xf32, #tpu.memory_space<vmem>>, vector<1x4x2x128xf32>
    %1 = vector.shape_cast %0 : vector<1x4x2x128xf32> to vector<4x2x128xf32>
    %2 = arith.mulf %1, %1 : vector<4x2x128xf32>
    %cst = arith.constant 0.000000e+00 : f32
    %3 = vector.broadcast %cst : f32 to vector<2x2x128xf32>
    %c0_3 = arith.constant 0 : index
    %c0_4 = arith.constant 0 : index
    %c0_5 = arith.constant 0 : index
    %4 = vector.load %arg4[%c0_3, %c0_4, %c0_5] : memref<8x2x128xf32, #tpu.memory_space<vmem>>, vector<2x2x128xf32>
    tpu.vector_store %arg4[%c0_3, %c0_4, %c0_5], %3 {strides = array<i32>} : memref<8x2x128xf32, #tpu.memory_space<vmem>>, vector<2x2x128xf32>,
    %c6 = arith.constant 6 : index
    %c0_6 = arith.constant 0 : index
    %c0_7 = arith.constant 0 : index
    %5 = vector.load %arg4[%c6, %c0_6, %c0_7] : memref<8x2x128xf32, #tpu.memory_space<vmem>>, vector<2x2x128xf32>
    tpu.vector_store %arg4[%c6, %c0_6, %c0_7], %3 {strides = array<i32>} : memref<8x2x128xf32, #tpu.memory_space<vmem>>, vector<2x2x128xf32>,
    %c2 = arith.constant 2 : index
    %c0_8 = arith.constant 0 : index
    %c0_9 = arith.constant 0 : index
    %6 = vector.load %arg4[%c2, %c0_8, %c0_9] : memref<8x2x128xf32, #tpu.memory_space<vmem>>, vector<4x2x128xf32>
    tpu.vector_store %arg4[%c2, %c0_8, %c0_9], %2 {strides = array<i32>} : memref<8x2x128xf32, #tpu.memory_space<vmem>>, vector<4x2x128xf32>,
    %c0_10 = arith.constant 0 : index
    %c0_11 = arith.constant 0 : index
    %c0_12 = arith.constant 0 : index
    %7 = vector.load %arg4[%c0_10, %c0_11, %c0_12] : memref<8x2x128xf32, #tpu.memory_space<vmem>>, vector<4x2x128xf32>
    %c1 = arith.constant 1 : index
    %c0_13 = arith.constant 0 : index
    %c0_14 = arith.constant 0 : index
    %8 = vector.load %arg4[%c1, %c0_13, %c0_14] : memref<8x2x128xf32, #tpu.memory_space<vmem>>, vector<4x2x128xf32>
    %9 = arith.addf %7, %8 : vector<4x2x128xf32>
    %10 = arith.addf %9, %2 : vector<4x2x128xf32>
    %c3 = arith.constant 3 : index
    %c0_15 = arith.constant 0 : index
    %c0_16 = arith.constant 0 : index
    %11 = vector.load %arg4[%c3, %c0_15, %c0_16] : memref<8x2x128xf32, #tpu.memory_space<vmem>>, vector<4x2x128xf32>
    %12 = arith.addf %10, %11 : vector<4x2x128xf32>
    %c4 = arith.constant 4 : index
    %c0_17 = arith.constant 0 : index
    %c0_18 = arith.constant 0 : index
    %13 = vector.load %arg4[%c4, %c0_17, %c0_18] : memref<8x2x128xf32, #tpu.memory_space<vmem>>, vector<4x2x128xf32>
    %14 = arith.addf %12, %13 : vector<4x2x128xf32>
    %cst_19 = arith.constant 9.99999974E-5 : f32
    %15 = vector.broadcast %cst_19 : f32 to vector<4x2x128xf32>
    %16 = arith.mulf %15, %14 : vector<4x2x128xf32>
    %cst_20 = arith.constant 2.000000e+00 : f32
    %17 = vector.broadcast %cst_20 : f32 to vector<4x2x128xf32>
    %18 = arith.addf %17, %16 : vector<4x2x128xf32>
    %19 = math.rsqrt %18 : vector<4x2x128xf32>
    %20 = math.sqrt %19 : vector<4x2x128xf32>
    %21 = arith.mulf %19, %20 : vector<4x2x128xf32>
    %22 = arith.mulf %1, %21 : vector<4x2x128xf32>
    %c0_21 = arith.constant 0 : index
    %c0_22 = arith.constant 0 : index
    %c0_23 = arith.constant 0 : index
    %c0_24 = arith.constant 0 : index
    %23 = vector.load %arg3[%c0_21, %c0_22, %c0_23, %c0_24] : memref<1x4x2x128xf32, #tpu.memory_space<vmem>>, vector<1x4x2x128xf32>
    %24 = vector.shape_cast %23 : vector<1x4x2x128xf32> to vector<4x2x128xf32>
    %25 = vector.shape_cast %22 : vector<4x2x128xf32> to vector<1x4x2x128xf32>
    tpu.vector_store %arg3[%c0_21, %c0_22, %c0_23, %c0_24], %25 {strides = array<i32>} : memref<1x4x2x128xf32, #tpu.memory_space<vmem>>, vector<1x4x2x128xf32>,
    return
  }
  func.func @transform_0(%arg0: i32, %arg1: i32) -> (i32, i32, i32, i32) {
    %c0_i32 = arith.constant 0 : i32
    %c0_i32_0 = arith.constant 0 : i32
    %c0_i32_1 = arith.constant 0 : i32
    return %arg0, %c0_i32, %arg1, %c0_i32_0 : i32, i32, i32, i32
  }
  func.func @transform_1(%arg0: i32, %arg1: i32) -> (i32, i32, i32, i32) {
    %c0_i32 = arith.constant 0 : i32
    %c0_i32_0 = arith.constant 0 : i32
    %c0_i32_1 = arith.constant 0 : i32
    return %arg0, %c0_i32, %arg1, %c0_i32_0 : i32, i32, i32, i32
  }
}

</mosaic_0001>

<bundles_post_ra>
// kernel: tpu_custom_call.1
= control target key start
LH: loop header
LB: loop body
LE: loop exit
PB: predicated region body
PF: predicated region fallthrough
CT: control target
= control target key end

     0   :  { %6 = vsyncpa [#allocation4], 0  ;;  %s787_s0 = inlined_call_operand.hbm [shape: f32[2,4,2,128], index: 0, kind: input, shape index: {}]   ;;  %s788_s1 = inlined_call_operand.hbm [shape: f32[2,4,2,128], index: 1, kind: output, shape index: {}]  }
   0x1   :  { %8 = vsyncpa [#allocation4 + $0x1], 0 }
   0x2   :  { %9 = vsyncpa [#allocation5], 0 }
   0x3   :  { %11 = vsyncpa [#allocation5 + $0x1], 0  ;;  %s588_s6 = smov 0   ;;  %s590_s7 = smov 0  }
   0x4   :  { %s592_s8 = smov 0   ;;  %s594_s9 = smov 0  }
   0x5   :  { %s596_s10 = smov 0   ;;  %s598_s11 = smov 0  }
   0x6 LB: > { %s357_s12 = sadd.s32 4294967295, %s569_s11   ;;  %s358_s13 = sadd.s32 4294967294, %s569_s11   ;;  %s569_s11 = sphi %s598_s11, %s17_s11   ;;  %s565_s10 = sphi %s596_s10, %s803_s10   ;;  %s561_s9 = sphi %s594_s9, %s802_s9   ;;  %s557_s8 = sphi %s592_s8, %s801_s8   ;;  %s553_s7 = sphi %s590_s7, %s800_s7   ;;  %s549_s6 = sphi %s588_s6, %s799_s6  }
   0x7   : > { %s29_s14 = sadd.s32 1, %s565_s10  ;;  %s38_s15 = sadd.s32 1, %s557_s8 }
   0x8   : > { %p31_p0 = scmp.ge.s32.totalorder %s29_s14, 2  ;;  %p45_p1 = scmp.ne.s32.totalorder %s557_s8, %s553_s7 }
   0x9   : > { %p46_p2 = scmp.eq.s32.totalorder %s569_s11, 0  ;;  %p51_p3 = scmp.ne.s32.totalorder %s553_s7, %s549_s6 }
   0xa   : > { %s805_s14 = smov (%p31_p0, %s29_s14), 0  ;;  %p52_p5 = scmp.eq.s32.totalorder %s357_s12, 0 }
   0xb   : > { %p629_p4 = por %p46_p2, %p45_p1  ;;  %s33_s17 = ssub.s32 %s565_s10, %s805_s14 }
   0xc   : > { %p77_p6 = scmp.eq.s32.totalorder %s357_s12, 1  ;;  %p36_p7 = scmp.eq.s32.totalorder %s33_s17, 0 }
   0xd   : > { %p635_p8 = por %p52_p5, %p51_p3  ;;  %p83_p10 = scmp.eq.s32.totalorder %s358_s13, 1 }
   0xe   : > { %p639_p9 = por %p77_p6, %p45_p1  ;;  %p386_p13 = scmp.lt.s32.totalorder %s569_s11, 2 }
   0xf   : > { %s644_s20 = scalar_select %p36_p7, %s557_s8, %s38_s15  }
  0x10   : > { %s792_s19 = scalar_select %p639_p9, 1, 0 }
  0x11   : > { %p646_p11 = por %p83_p10, %p51_p3  ;;  %s103_s22 = sand.u32 1, %s557_s8  }
  0x12   : > { %s361_s23 = sshll.u32 %s103_s22, 3  ;;  %s372_s24 = sshll.u32 %s565_s10, 7 }
  0x13   : > { %s793_s21 = scalar_select %p646_p11, 1, 0 }
  0x14   : > { %s657_s27 = scalar_lea.hbm %s787_s0, %s372_s24  ;;  %s107_s28 = scalar_lea.vmem [#allocation3], %s361_s23 }
  0x15   : > { %s115_s29 = sshll.u32 %s107_s28, 4  ;;  %p663_p0 = pnand %p386_p13, %p629_p4  ;;  %s659_s29 = int_to_ptr.vmem [resolvable:$true] %s115_s29 }
  0x16   : > { %s668_s2 = scalar_lea.sflag [#allocation4], %s103_s22  ;;  %s457_s3 = scalar_lea.hbm %s657_s27, 128 }
  0x17   : > { %p458_p2 = scmp.ne.s32.totalorder %s657_s27, %s457_s3  ;;  %p459_p3 = pneg %p663_p0 }
  0x18   : > { %s462_s12 = scalar_lea.hbm %s787_s0, 256  ;;  %p463_p4 = scmp.lt.u32.totalorder %s657_s27, %s787_s0 }
  0x19   : > { %p460_p5 = pnand %p459_p3, %p458_p2  ;;  %p464_p7 = scmp.lt.u32.totalorder %s462_s12, %s457_s3 }
  0x1a   : > { %p466_p13 = scmp.lt.u32.totalorder %s457_s3, %s657_s27 }
  0x1b   : > { %p461_p6 = pneg %p460_p5  ;;  %p465_p10 = por %p464_p7, %p463_p4 }
  0x1d   : > { %p467_p12 = por %p466_p13, %p465_p10 }
  0x1f   : > { %p468_p1 = pnand %p467_p12, %p461_p6 }
  0x21   : > { %471 = shalt.err (!%p468_p1)
}
  0x22   : > { %s472_s16 = scalar_lea.vmem %s659_s29, 128  ;;  %s571_s17 = smov [#allocation3]  }
  0x23   : > { %p473_p2 = scmp.ne.s32.totalorder %s659_s29, %s472_s16  ;;  %s477_s22 = sshll.u32 %s571_s17, 4  ;;  %s478_s22 = int_to_ptr.vmem [resolvable:$false] %s477_s22 }
  0x24   : > { %s479_s23 = scalar_lea.vmem %s478_s22, 256  ;;  %p480_p9 = scmp.lt.s32.totalorder %s659_s29, %s478_s22 }
  0x25   : > { %p475_p5 = pnand %p473_p2, %p459_p3  ;;  %p481_p4 = scmp.lt.s32.totalorder %s479_s23, %s472_s16 }
  0x27   : > { %p476_p11 = pneg %p475_p5  ;;  %p482_p7 = por %p481_p4, %p480_p9 }
  0x29   : > { %p483_p10 = pnand %p482_p7, %p476_p11 }
  0x2b   : > { %486 = shalt.err (!%p483_p10)
}
  0x2c   : > { %s572_s24 = smov 32   ;;  %s573_s25 = smov 2  }
  0x2d   : > { %381 = dma.hbm_to_vmem [thread:$0]  (!%p663_p0), %s657_s27, 128, %s659_s29, %s668_s2, %s572_s24, %s572_s24, %s573_s25  }
  0x2e   : > { %p123_p12 = scmp.lt.s32.totalorder %s569_s11, 3  ;;  %p795_p1 = scmp.ge.s32.totalorder %s569_s11, 1 }
  0x30   : > { %p124_p3 = pnand %p795_p1, %p123_p12 }
  0x31   : > { %s700_s26 = sand.u32 (!%p124_p3), 1, %s553_s7  }
  0x32   : > { %127 = sbr.rel (%p124_p3) target bundleno = 128 (0x80), region = 24  ;;  %s365_s28 = sshll.u32 (!%p124_p3), %s700_s26, 3 }
  0x33   : > { %s130_s3 = scalar_lea.sflag (!%p124_p3), [#allocation4], %s700_s26  ;;  %s133_s4 = scalar_lea.vmem (!%p124_p3), [#allocation3], %s365_s28 }
  0x39   : > { %540 = dma.done.wait (%p635_p8), %s130_s3, 128  }
  0x3a   : > { %542 = vsyncadd (%p635_p8), %s130_s3, 4294967168  ;;  %v574_v0 = vmov 0.0   ;;  %v710_v1 = vld [vmem:[%s133_s4] sm:$0x3]  ;;  %v712_v2 = vld [vmem:[%s133_s4 + $0x2] sm:$0x3] }
  0x3b   : > { %160 = vst [vmem:[#allocation2] sm:$0x3] %v574_v0  ;;  %161 = vst [vmem:[#allocation2 + $0x2] sm:$0x3] %v574_v0  ;;  %v714_v3 = vld [vmem:[%s133_s4 + $0x4] sm:$0x3]  ;;  %v156_v4 = vmul.f32 %v710_v1, %v710_v1  ;;  %v157_v6 = vmul.f32 %v712_v2, %v712_v2 }
  0x3c   : > { %163 = vst [vmem:[#allocation2 + $0xc] sm:$0x3] %v574_v0  ;;  %164 = vst [vmem:[#allocation2 + $0xe] sm:$0x3] %v574_v0  ;;  %v158_v7 = vmul.f32 %v714_v3, %v714_v3  ;;  %v722_v9 = vld [vmem:[%s133_s4 + $0x6] sm:$0x3] }
  0x3d   : > { %166 = vst [vmem:[#allocation2 + $0x4] sm:$0x3] %v156_v4  ;;  %167 = vst [vmem:[#allocation2 + $0x6] sm:$0x3] %v157_v6  ;;  %v159_v11 = vmul.f32 %v722_v9, %v722_v9  ;;  %s151_s18 = scalar_lea.vmem [#allocation6], %s365_s28  ;;  %s373_s29 = sshll.u32 %s561_s9, 7 }
  0x3e   : > { %168 = vst [vmem:[#allocation2 + $0x8] sm:$0x3] %v158_v7  ;;  %s272_s27 = sshll.u32 %s151_s18, 4  ;;  %s737_s5 = scalar_lea.hbm %s788_s1, %s373_s29  ;;  %s731_s27 = int_to_ptr.vmem [resolvable:$true] %s272_s27 }
  0x3f   : > { %169 = vst [vmem:[#allocation2 + $0xa] sm:$0x3] %v159_v11  ;;  %s258_s9 = scalar_lea.sflag [#allocation5], %s700_s26  ;;  %s487_s12 = scalar_lea.vmem %s731_s27, 128 }
  0x40   : > { %p488_p8 = scmp.ne.s32.totalorder %s731_s27, %s487_s12  ;;  %p796_p9 = scmp.ne.s32.totalorder %s792_s19, 0 }
  0x41   : > { %s575_s13 = smov [#allocation6]  }
  0x42   : > { %v170_v5 = vld [vmem:[#allocation2] sm:$0x3]  ;;  %v175_v8 = vld [vmem:[#allocation2 + $0x2] sm:$0x3]  ;;  %p489_p11 = pnand %p488_p8, %p796_p9  ;;  %s491_s15 = sshll.u32 %s575_s13, 4  ;;  %s492_s15 = int_to_ptr.vmem [resolvable:$false] %s491_s15 }
  0x43   : > { %v179_v10 = vadd.f32 %v175_v8, %v170_v5  ;;  %v171_v13 = vld [vmem:[#allocation2 + $0x2] sm:$0x3]  ;;  %v191_v30 = vld [vmem:[#allocation2 + $0xc] sm:$0x3]  ;;  %v200_v34 = vld [vmem:[#allocation2 + $0xe] sm:$0x3]  ;;  %p494_p6 = scmp.lt.s32.totalorder %s731_s27, %s492_s15 }
  0x44   : > { %v176_v14 = vld [vmem:[#allocation2 + $0x4] sm:$0x3]  ;;  %v188_v15 = vld [vmem:[#allocation2 + $0x6] sm:$0x3]  ;;  %v199_v37 = vld [vmem:[#allocation2 + $0xc] sm:$0x3]  ;;  %p490_p0 = pneg %p489_p11 }
  0x45   : > { %v183_v12 = vadd.f32 %v179_v10, %v156_v4  ;;  %v172_v16 = vld [vmem:[#allocation2 + $0x4] sm:$0x3]  ;;  %v180_v17 = vadd.f32 %v176_v14, %v171_v13  ;;  %v177_v19 = vld [vmem:[#allocation2 + $0x6] sm:$0x3]  ;;  %v197_v21 = vld [vmem:[#allocation2 + $0x8] sm:$0x3] }
  0x46   : > { %v181_v20 = vadd.f32 %v177_v19, %v172_v16  ;;  %v173_v22 = vld [vmem:[#allocation2 + $0x6] sm:$0x3]  ;;  %v178_v23 = vld [vmem:[#allocation2 + $0x8] sm:$0x3]  ;;  %v190_v27 = vld [vmem:[#allocation2 + $0xa] sm:$0x3] }
  0x47   : > { %v192_v18 = vadd.f32 %v188_v15, %v183_v12  ;;  %v184_v24 = vadd.f32 %v180_v17, %v157_v6  ;;  %v182_v26 = vadd.f32 %v178_v23, %v173_v22  ;;  %v189_v29 = vld [vmem:[#allocation2 + $0x8] sm:$0x3]  ;;  %v198_v36 = vld [vmem:[#allocation2 + $0xa] sm:$0x3]  ;;  %s493_s16 = scalar_lea.vmem %s492_s15, 256 }
  0x48   : > { %v185_v28 = vadd.f32 %v181_v20, %v158_v7  ;;  %p495_p13 = scmp.lt.s32.totalorder %s493_s16, %s487_s12 }
  0x49   : > { %v201_v25 = vadd.f32 %v197_v21, %v192_v18  ;;  %v193_v31 = vadd.f32 %v189_v29, %v184_v24  ;;  %v186_v33 = vadd.f32 %v182_v26, %v159_v11 }
  0x4a   : > { %v194_v35 = vadd.f32 %v190_v27, %v185_v28  ;;  %p496_p2 = por %p495_p13, %p494_p6 }
  0x4b   : > { %v205_v32 = vmul.f32 0.0001, %v201_v25  ;;  %v195_v39 = vadd.f32 %v191_v30, %v186_v33  ;;  %v202_v40 = vadd.f32 %v198_v36, %v193_v31 }
  0x4c   : > { %v203_v41 = vadd.f32 %v199_v37, %v194_v35  ;;  %p497_p5 = pnand %p496_p2, %p490_p0 }
  0x4d   : > { %v209_v38 = vadd.f32 2.0, %v205_v32  ;;  %v206_v42 = vmul.f32 0.0001, %v202_v40  ;;  %v204_v43 = vadd.f32 %v200_v34, %v195_v39 }
  0x4e   : > { %v207_v44 = vmul.f32 0.0001, %v203_v41 }
  0x4f   : > { %441 = vrsqrt.f32 %v209_v38  ;;  %v210_v45 = vadd.f32 2.0, %v206_v42  ;;  %v208_v46 = vmul.f32 0.0001, %v204_v43 }
  0x50   : > { %v211_v47 = vadd.f32 2.0, %v207_v44 }
  0x51   : > { %443 = vrsqrt.f32 %v210_v45  ;;  %v212_v48 = vadd.f32 2.0, %v208_v46 }
  0x52   : > { %445 = vrsqrt.f32 %v211_v47 }
  0x53   : > { %447 = vrsqrt.f32 %v212_v48 }
  0x59   : > { %v442_v49 = vpop.eup %441 }
  0x5a   : > { %449 = vrsqrt.f32 %v442_v49  ;;  %vm219_vm0 = vcmp.eq.f32.partialorder %v442_v49, inf  ;;  %v222_v55 = vand.u32 2147483648, %v442_v49  ;;  %vm221_vm1 = vcmp.eq.f32.partialorder %v442_v49, 0.0 }
  0x5b   : > { %v444_v50 = vpop.eup %443 }
  0x5c   : > { %v446_v51 = vpop.eup %445  ;;  %451 = vrsqrt.f32 %v444_v50  ;;  %vm226_vm2 = vcmp.eq.f32.partialorder %v444_v50, inf  ;;  %vm228_vm3 = vcmp.eq.f32.partialorder %v444_v50, 0.0  ;;  %v229_v63 = vand.u32 2147483648, %v444_v50 }
  0x5d   : > { %v448_v52 = vpop.eup %447  ;;  %453 = vrsqrt.f32 %v446_v51  ;;  %vm233_vm4 = vcmp.eq.f32.partialorder %v446_v51, inf  ;;  %vm235_vm5 = vcmp.eq.f32.partialorder %v446_v51, 0.0  ;;  %v236_v6 = vand.u32 2147483648, %v446_v51 }
  0x5e   : > { %455 = vrsqrt.f32 %v448_v52  ;;  %vm240_vm6 = vcmp.eq.f32.partialorder %v448_v52, inf  ;;  %v243_v11 = vand.u32 2147483648, %v448_v52  ;;  %vm242_vm7 = vcmp.eq.f32.partialorder %v448_v52, 0.0 }
  0x64   : > { %v450_v53 = vpop.eup %449 }
  0x65   : > { %v218_v54 = vmul.f32 %v450_v53, %v442_v49 }
  0x66   : > { %v452_v57 = vpop.eup %451 }
  0x67   : > { %v220_v56 = vsel %vm219_vm0, %v442_v49, %v218_v54  ;;  %v454_v59 = vpop.eup %453  ;;  %v225_v61 = vmul.f32 %v452_v57, %v444_v50 }
  0x68   : > { %v223_v58 = vsel %vm221_vm1, %v222_v55, %v220_v56  ;;  %v456_v62 = vpop.eup %455  ;;  %v232_v0 = vmul.f32 %v454_v59, %v446_v51 }
  0x69   : > { %v245_v60 = vmul.f32 %v442_v49, %v223_v58  ;;  %v227_v5 = vsel %vm226_vm2, %v444_v50, %v225_v61  ;;  %v239_v7 = vmul.f32 %v456_v62, %v448_v52 }
  0x6a   : > { %v230_v8 = vsel %vm228_vm3, %v229_v63, %v227_v5  ;;  %v234_v10 = vsel %vm233_vm4, %v446_v51, %v232_v0 }
  0x6b   : > { %v249_v4 = vmul.f32 %v245_v60, %v710_v1  ;;  %v246_v12 = vmul.f32 %v444_v50, %v230_v8  ;;  %v237_v13 = vsel %vm235_vm5, %v236_v6, %v234_v10  ;;  %v241_v14 = vsel %vm240_vm6, %v448_v52, %v239_v7 }
  0x6c   : > { %v247_v15 = vmul.f32 %v446_v51, %v237_v13  ;;  %v244_v1 = vsel %vm242_vm7, %v243_v11, %v241_v14 }
  0x6d   : > { %253 = vst [vmem:[%s151_s18] sm:$0x3] %v249_v4  ;;  %v250_v16 = vmul.f32 %v246_v12, %v712_v2  ;;  %v248_v17 = vmul.f32 %v448_v52, %v244_v1 }
  0x6e   : > { %v251_v18 = vmul.f32 %v247_v15, %v714_v3 }
  0x6f   : > { %254 = vst [vmem:[%s151_s18 + $0x2] sm:$0x3] %v250_v16  ;;  %v252_v19 = vmul.f32 %v248_v17, %v722_v9 }
  0x70   : > { %255 = vst [vmem:[%s151_s18 + $0x4] sm:$0x3] %v251_v18 }
  0x71   : > { %256 = vst [vmem:[%s151_s18 + $0x6] sm:$0x3] %v252_v19 }
  0x72   : > { %500 = shalt.err (!%p497_p5)
}
  0x73   : > { %s501_s17 = scalar_lea.hbm %s737_s5, 128  ;;  %s505_s24 = scalar_lea.hbm %s788_s1, 256 }
  0x74   : > { %p502_p4 = scmp.ne.s32.totalorder %s737_s5, %s501_s17  ;;  %p506_p12 = scmp.lt.u32.totalorder %s737_s5, %s788_s1 }
  0x75   : > { %p507_p1 = scmp.lt.u32.totalorder %s505_s24, %s501_s17  ;;  %p509_p8 = scmp.lt.u32.totalorder %s501_s17, %s737_s5 }
  0x76   : > { %p503_p7 = pnand %p502_p4, %p796_p9 }
  0x77   : > { %p508_p3 = por %p507_p1, %p506_p12 }
  0x78   : > { %p504_p10 = pneg %p503_p7 }
  0x79   : > { %p510_p11 = por %p509_p8, %p508_p3 }
  0x7b   : > { %p511_p0 = pnand %p510_p11, %p504_p10 }
  0x7d   : > { %514 = shalt.err (!%p511_p0)
}
  0x7e   : > { %s576_s3 = smov 32   ;;  %s577_s4 = smov 2  }
  0x7f   : > { %376 = dma.vmem_to_hbm [thread:$0]  (%p796_p9), %s731_s27, 128, %s737_s5, %s258_s9, %s576_s3, %s576_s3, %s577_s4  }
  0x80 PF: > { %s287_s18 = sand.u32 1, %s549_s6   ;;  %p797_p6 = scmp.ne.s32.totalorder %s793_s21, 0 }
  0x81   : > { %p798_p13 = scmp.ge.s32.totalorder %s569_s11, 2  ;;  %s288_s29 = scalar_lea.sflag [#allocation5], %s287_s18 }
  0x83   : > { %p383_p2 = pnand %p798_p13, %p797_p6 }
  0x85   : > { %544 = dma.done.wait (!%p383_p2), %s288_s29, 128  }
  0x86   : > { %546 = vsyncadd (!%p383_p2), %s288_s29, 4294967168  ;;  %s17_s11 = sadd.s32 1, %s569_s11   ;;  %s799_s6 = smov %s553_s7 }
  0x87   : > { %p14_p5 = scmp.ge.s32.totalorder %s17_s11, 4   ;;  %s800_s7 = smov %s557_s8 }
  0x88   : > { %s801_s8 = smov %s644_s20  ;;  %s802_s9 = smov %s565_s10 }
  0x89   : > { %s803_s10 = smov %s805_s14  ;;  %16 = sbr.rel (!%p14_p5) target bundleno = 6 (0x6), region = 74 }
  0x90   :  { %293 = vsyncpa [#allocation4], 1 }
  0x91   :  { %295 = vsyncpa [#allocation4 + $0x1], 1 }
  0x92   :  { %296 = vsyncpa [#allocation5], 1 }
  0x93   :  { %298 = vsyncpa [#allocation5 + $0x1], 1 }

</bundles_post_ra>
